<compile_context>
chip_gen: v7x
topology: tpu7x:2x2x1
jax: 0.10.0
libtpu: 0.0.40
codegen_flags: <defaults>
</compile_context>

<pallas_src>
import jax
import jax.numpy as jnp
from jax.experimental import pallas as pl
from jax.experimental.pallas import tpu as pltpu


def make_lstm_fc_kernel(T, B, I, H):
    """Builds the whole-model kernel for static (T, B, I, H).

    Kernel args:
      x_ref : (T*B, I)      time-major-then-batch flattened input
      p_ref : (H+I+5, 4H)   packed params:
                rows [0, H)       : w_hh^T          (H, 4H)
                rows [H, H+I)     : w_ih^T          (I, 4H)
                row  H+I          : b_ih + b_hh     (1, 4H)
                row  H+I+1        : w_fc (padded)   (1, 4H)  (first H lanes valid)
                row  H+I+2        : b_fc at lane 0  (1, 4H)
                row  H+I+3        : act scale row   (0.5 on i/f/o quarters, 1.0 on g)
                row  H+I+4        : act shift row   (0.5 on i/f/o quarters, 0.0 on g)
      out_ref : (B, 1)      fc(h_T)
    """
    G = 4 * H

    def kernel(x_ref, p_ref, out_ref):
        # ---- static slices of the packed parameter slab ---------------------
        w_hh  = p_ref[0:H, :]                         # (H, 4H), tile-aligned
        w_ih  = p_ref[H:H + I, :]                     # (I, 4H)
        bias  = p_ref[H + I:H + I + 1, :]             # (1, 4H)
        w_fc  = p_ref[H + I + 1:H + I + 2, 0:H]       # (1, H)
        b_fc  = p_ref[H + I + 2:H + I + 3, 0:1]       # (1, 1)
        scale = p_ref[H + I + 3:H + I + 4, :]         # (1, 4H) pre/post tanh scale
        shift = p_ref[H + I + 4:H + I + 5, :]         # (1, 4H) post tanh shift

        # ---- prologue: hoist input contribution for all steps (T*B, 4H) -----
        x_all = x_ref[...]                            # (T*B, I)
        if I == 1:
            gx = x_all * w_ih                         # (T*B,1)*(1,4H) broadcast
        else:
            gx = jnp.dot(x_all, w_ih, preferred_element_type=jnp.float32)
        gates_x = gx + bias                           # (T*B, 4H)

        h = jnp.zeros((B, H), jnp.float32)
        c = jnp.zeros((B, H), jnp.float32)

        # ---- fully unrolled recurrence (T static) ----------------------------
        for t in range(T):
            # Only the hidden->gates matmul remains on the serial chain.
            g_row = gates_x[t * B:(t + 1) * B, :] + jnp.dot(
                h, w_hh, preferred_element_type=jnp.float32)      # (B, 4H)
            # One tanh pass over the whole row; sigmoid quarters via
            # sigmoid(x) = 0.5 * tanh(x/2) + 0.5  (exact up to rounding).
            y = jnp.tanh(g_row * scale)                           # single EUP pass
            act = y * scale + shift            # [sig_i | sig_f | tanh_g | sig_o]
            i_g = act[:, 0 * H:1 * H]
            f_g = act[:, 1 * H:2 * H]
            g_g = act[:, 2 * H:3 * H]
            o_g = act[:, 3 * H:4 * H]
            c = f_g * c + i_g * g_g
            h = o_g * jnp.tanh(c)                                 # 2nd EUP pass

        # ---- epilogue: fc(h_T) on VPU + lane reduce (no 1-column MXU call) ---
        out_ref[...] = jnp.sum(h * w_fc, axis=-1, keepdims=True) + b_fc

    return kernel


def lstm_model_forward(x, params):
    """x: (B, T, I) batch-first, float32. Returns (B, 1) == fc(h_T)."""
    B, T, I = x.shape
    H = params["w_hh"].shape[1]                       # w_hh: (4H, H)
    G = 4 * H

    # Time-major, packed (T*B, I) so per-step reads are sublane slices.
    x_flat = jnp.transpose(x, (1, 0, 2)).reshape(T * B, I).astype(jnp.float32)

    # Pack every parameter + the activation constant rows into one (H+I+5, 4H)
    # f32 slab (built once, outside the hot path).
    w_hh_T = params["w_hh"].T.astype(jnp.float32)                      # (H, G)
    w_ih_T = params["w_ih"].T.astype(jnp.float32)                      # (I, G)
    bias = (params["b_ih"] + params["b_hh"]).reshape(1, G).astype(jnp.float32)
    w_fc_row = jnp.zeros((1, G), jnp.float32).at[0, :H].set(
        params["w_fc"].reshape(H).astype(jnp.float32))
    b_fc_row = jnp.zeros((1, G), jnp.float32).at[0, 0].set(
        params["b_fc"].reshape(()).astype(jnp.float32))
    lane = jnp.arange(G)
    is_g = (lane >= 2 * H) & (lane < 3 * H)
    scale_row = jnp.where(is_g, 1.0, 0.5).astype(jnp.float32).reshape(1, G)
    shift_row = jnp.where(is_g, 0.0, 0.5).astype(jnp.float32).reshape(1, G)

    packed = jnp.concatenate(
        [w_hh_T, w_ih_T, bias, w_fc_row, b_fc_row, scale_row, shift_row], axis=0)

    kernel = make_lstm_fc_kernel(T, B, I, H)
    vmem_spec = pl.BlockSpec(memory_space=pltpu.MemorySpace.VMEM)
    return pl.pallas_call(
        kernel,
        out_shape=jax.ShapeDtypeStruct((B, 1), jnp.float32),
        in_specs=[vmem_spec, vmem_spec],
        out_specs=vmem_spec,
    )(x_flat, packed)


def init_params(key, input_size=1, hidden_size=32):
    """Deterministic init matching PyTorch shapes (uniform +-1/sqrt(hidden))."""
    k = 1.0 / jnp.sqrt(jnp.float32(hidden_size))
    ks = jax.random.split(key, 6)
    u = lambda kk, shape: jax.random.uniform(kk, shape, jnp.float32, -k, k)
    return {
        "w_ih": u(ks[0], (4 * hidden_size, input_size)),
        "w_hh": u(ks[1], (4 * hidden_size, hidden_size)),
        "b_ih": u(ks[2], (4 * hidden_size,)),
        "b_hh": u(ks[3], (4 * hidden_size,)),
        "w_fc": u(ks[4], (1, hidden_size)),
        "b_fc": u(ks[5], (1,)),
    }


def reference_forward(x, params):
    """Pure-JAX reference of the PyTorch forward (for correctness check)."""
    H = params["w_hh"].shape[1]
    B = x.shape[0]
    w_ih_T = params["w_ih"].T
    w_hh_T = params["w_hh"].T
    b = params["b_ih"] + params["b_hh"]

    def step(carry, x_t):
        h, c = carry
        gates = x_t @ w_ih_T + h @ w_hh_T + b
        i_g = jax.nn.sigmoid(gates[:, 0 * H:1 * H])
        f_g = jax.nn.sigmoid(gates[:, 1 * H:2 * H])
        g_g = jnp.tanh(gates[:, 2 * H:3 * H])
        o_g = jax.nn.sigmoid(gates[:, 3 * H:4 * H])
        c_new = f_g * c + i_g * g_g
        h_new = o_g * jnp.tanh(c_new)
        return (h_new, c_new), None

    init = (jnp.zeros((B, H), jnp.float32), jnp.zeros((B, H), jnp.float32))
    (h_final, _), _ = jax.lax.scan(step, init, jnp.transpose(x, (1, 0, 2)))
    return h_final @ params["w_fc"].T + params["b_fc"]


if __name__ == "__main__":
    B, T, I, H = 2, 8, 1, 32
    key = jax.random.PRNGKey(0)
    key_x, key_p = jax.random.split(key)

    x = jax.random.normal(key_x, (B, T, I), jnp.float32)   # batch-first, like PyTorch
    params = init_params(key_p, input_size=I, hidden_size=H)

    out = lstm_model_forward(x, params)
    out = jax.block_until_ready(out)

    ref = reference_forward(x, params)
    assert out.shape == (B, 1)
    assert jnp.allclose(out, ref, atol=1e-4, rtol=1e-4), (out, ref)

    print("KERNEL_OK")
</pallas_src>

<mosaic_0001>
module attributes {stable_mosaic.version = 11 : i64} {
  func.func @kernel(%arg0: memref<16x1xf32, #tpu.memory_space<vmem>>, %arg1: memref<38x128xf32, #tpu.memory_space<vmem>>, %arg2: memref<2x1xf32, #tpu.memory_space<vmem>>) attributes {dimension_semantics = [], scalar_prefetch = 0 : i64, scratch_operands = 0 : i64, tpu.core_type = #tpu.core_type<tc>} {
    %c0 = arith.constant 0 : index
    %c0_0 = arith.constant 0 : index
    %0 = vector.load %arg1[%c0, %c0_0] : memref<38x128xf32, #tpu.memory_space<vmem>>, vector<32x128xf32>
    %c32 = arith.constant 32 : index
    %c0_1 = arith.constant 0 : index
    %1 = vector.load %arg1[%c32, %c0_1] : memref<38x128xf32, #tpu.memory_space<vmem>>, vector<1x128xf32>
    %c33 = arith.constant 33 : index
    %c0_2 = arith.constant 0 : index
    %2 = vector.load %arg1[%c33, %c0_2] : memref<38x128xf32, #tpu.memory_space<vmem>>, vector<1x128xf32>
    %c34 = arith.constant 34 : index
    %c0_3 = arith.constant 0 : index
    %3 = vector.load %arg1[%c34, %c0_3] : memref<38x128xf32, #tpu.memory_space<vmem>>, vector<1x32xf32>
    %c35 = arith.constant 35 : index
    %c0_4 = arith.constant 0 : index
    %4 = vector.load %arg1[%c35, %c0_4] : memref<38x128xf32, #tpu.memory_space<vmem>>, vector<1x1xf32>
    %c36 = arith.constant 36 : index
    %c0_5 = arith.constant 0 : index
    %5 = vector.load %arg1[%c36, %c0_5] : memref<38x128xf32, #tpu.memory_space<vmem>>, vector<1x128xf32>
    %c37 = arith.constant 37 : index
    %c0_6 = arith.constant 0 : index
    %6 = vector.load %arg1[%c37, %c0_6] : memref<38x128xf32, #tpu.memory_space<vmem>>, vector<1x128xf32>
    %c0_7 = arith.constant 0 : index
    %c0_8 = arith.constant 0 : index
    %7 = vector.load %arg0[%c0_7, %c0_8] : memref<16x1xf32, #tpu.memory_space<vmem>>, vector<16x1xf32>
    %8 = vector.broadcast %7 : vector<16x1xf32> to vector<16x128xf32>
    %9 = vector.broadcast %1 : vector<1x128xf32> to vector<16x128xf32>
    %10 = arith.mulf %8, %9 : vector<16x128xf32>
    %11 = vector.broadcast %2 : vector<1x128xf32> to vector<16x128xf32>
    %12 = arith.addf %10, %11 : vector<16x128xf32>
    %cst = arith.constant 0.000000e+00 : f32
    %13 = vector.broadcast %cst : f32 to vector<2x32xf32>
    %cst_9 = arith.constant 0.000000e+00 : f32
    %14 = vector.broadcast %cst_9 : f32 to vector<2x32xf32>
    %15 = vector.extract_strided_slice %12 {offsets = [0, 0], sizes = [2, 128], strides = [1, 1]} : vector<16x128xf32> to vector<2x128xf32>
    %cst_10 = arith.constant dense<0.000000e+00> : vector<2x128xf32>
    %16 = tpu.matmul %13, %0, %cst_10 {dimension_numbers = #tpu.dot_dimension_numbers<[1], [0], [0], [1], [0, 0, 1, 1], [], []>} : vector<2x32xf32>, vector<32x128xf32>, vector<2x128xf32> -> vector<2x128xf32>
    %17 = arith.addf %15, %16 : vector<2x128xf32>
    %18 = vector.broadcast %5 : vector<1x128xf32> to vector<2x128xf32>
    %19 = arith.mulf %17, %18 : vector<2x128xf32>
    %20 = math.tanh %19 : vector<2x128xf32>
    %21 = vector.broadcast %5 : vector<1x128xf32> to vector<2x128xf32>
    %22 = arith.mulf %20, %21 : vector<2x128xf32>
    %23 = vector.broadcast %6 : vector<1x128xf32> to vector<2x128xf32>
    %24 = arith.addf %22, %23 : vector<2x128xf32>
    %25 = vector.extract_strided_slice %24 {offsets = [0, 0], sizes = [2, 32], strides = [1, 1]} : vector<2x128xf32> to vector<2x32xf32>
    %26 = vector.extract_strided_slice %24 {offsets = [0, 32], sizes = [2, 32], strides = [1, 1]} : vector<2x128xf32> to vector<2x32xf32>
    %27 = vector.extract_strided_slice %24 {offsets = [0, 64], sizes = [2, 32], strides = [1, 1]} : vector<2x128xf32> to vector<2x32xf32>
    %28 = vector.extract_strided_slice %24 {offsets = [0, 96], sizes = [2, 32], strides = [1, 1]} : vector<2x128xf32> to vector<2x32xf32>
    %29 = arith.mulf %26, %14 : vector<2x32xf32>
    %30 = arith.mulf %25, %27 : vector<2x32xf32>
    %31 = arith.addf %29, %30 : vector<2x32xf32>
    %32 = math.tanh %31 : vector<2x32xf32>
    %33 = arith.mulf %28, %32 : vector<2x32xf32>
    %34 = vector.extract_strided_slice %12 {offsets = [2, 0], sizes = [2, 128], strides = [1, 1]} : vector<16x128xf32> to vector<2x128xf32>
    %cst_11 = arith.constant dense<0.000000e+00> : vector<2x128xf32>
    %35 = tpu.matmul %33, %0, %cst_11 {dimension_numbers = #tpu.dot_dimension_numbers<[1], [0], [0], [1], [0, 0, 1, 1], [], []>} : vector<2x32xf32>, vector<32x128xf32>, vector<2x128xf32> -> vector<2x128xf32>
    %36 = arith.addf %34, %35 : vector<2x128xf32>
    %37 = vector.broadcast %5 : vector<1x128xf32> to vector<2x128xf32>
    %38 = arith.mulf %36, %37 : vector<2x128xf32>
    %39 = math.tanh %38 : vector<2x128xf32>
    %40 = vector.broadcast %5 : vector<1x128xf32> to vector<2x128xf32>
    %41 = arith.mulf %39, %40 : vector<2x128xf32>
    %42 = vector.broadcast %6 : vector<1x128xf32> to vector<2x128xf32>
    %43 = arith.addf %41, %42 : vector<2x128xf32>
    %44 = vector.extract_strided_slice %43 {offsets = [0, 0], sizes = [2, 32], strides = [1, 1]} : vector<2x128xf32> to vector<2x32xf32>
    %45 = vector.extract_strided_slice %43 {offsets = [0, 32], sizes = [2, 32], strides = [1, 1]} : vector<2x128xf32> to vector<2x32xf32>
    %46 = vector.extract_strided_slice %43 {offsets = [0, 64], sizes = [2, 32], strides = [1, 1]} : vector<2x128xf32> to vector<2x32xf32>
    %47 = vector.extract_strided_slice %43 {offsets = [0, 96], sizes = [2, 32], strides = [1, 1]} : vector<2x128xf32> to vector<2x32xf32>
    %48 = arith.mulf %45, %31 : vector<2x32xf32>
    %49 = arith.mulf %44, %46 : vector<2x32xf32>
    %50 = arith.addf %48, %49 : vector<2x32xf32>
    %51 = math.tanh %50 : vector<2x32xf32>
    %52 = arith.mulf %47, %51 : vector<2x32xf32>
    %53 = vector.extract_strided_slice %12 {offsets = [4, 0], sizes = [2, 128], strides = [1, 1]} : vector<16x128xf32> to vector<2x128xf32>
    %cst_12 = arith.constant dense<0.000000e+00> : vector<2x128xf32>
    %54 = tpu.matmul %52, %0, %cst_12 {dimension_numbers = #tpu.dot_dimension_numbers<[1], [0], [0], [1], [0, 0, 1, 1], [], []>} : vector<2x32xf32>, vector<32x128xf32>, vector<2x128xf32> -> vector<2x128xf32>
    %55 = arith.addf %53, %54 : vector<2x128xf32>
    %56 = vector.broadcast %5 : vector<1x128xf32> to vector<2x128xf32>
    %57 = arith.mulf %55, %56 : vector<2x128xf32>
    %58 = math.tanh %57 : vector<2x128xf32>
    %59 = vector.broadcast %5 : vector<1x128xf32> to vector<2x128xf32>
    %60 = arith.mulf %58, %59 : vector<2x128xf32>
    %61 = vector.broadcast %6 : vector<1x128xf32> to vector<2x128xf32>
    %62 = arith.addf %60, %61 : vector<2x128xf32>
    %63 = vector.extract_strided_slice %62 {offsets = [0, 0], sizes = [2, 32], strides = [1, 1]} : vector<2x128xf32> to vector<2x32xf32>
    %64 = vector.extract_strided_slice %62 {offsets = [0, 32], sizes = [2, 32], strides = [1, 1]} : vector<2x128xf32> to vector<2x32xf32>
    %65 = vector.extract_strided_slice %62 {offsets = [0, 64], sizes = [2, 32], strides = [1, 1]} : vector<2x128xf32> to vector<2x32xf32>
    %66 = vector.extract_strided_slice %62 {offsets = [0, 96], sizes = [2, 32], strides = [1, 1]} : vector<2x128xf32> to vector<2x32xf32>
    %67 = arith.mulf %64, %50 : vector<2x32xf32>
    %68 = arith.mulf %63, %65 : vector<2x32xf32>
    %69 = arith.addf %67, %68 : vector<2x32xf32>
    %70 = math.tanh %69 : vector<2x32xf32>
    %71 = arith.mulf %66, %70 : vector<2x32xf32>
    %72 = vector.extract_strided_slice %12 {offsets = [6, 0], sizes = [2, 128], strides = [1, 1]} : vector<16x128xf32> to vector<2x128xf32>
    %cst_13 = arith.constant dense<0.000000e+00> : vector<2x128xf32>
    %73 = tpu.matmul %71, %0, %cst_13 {dimension_numbers = #tpu.dot_dimension_numbers<[1], [0], [0], [1], [0, 0, 1, 1], [], []>} : vector<2x32xf32>, vector<32x128xf32>, vector<2x128xf32> -> vector<2x128xf32>
    %74 = arith.addf %72, %73 : vector<2x128xf32>
    %75 = vector.broadcast %5 : vector<1x128xf32> to vector<2x128xf32>
    %76 = arith.mulf %74, %75 : vector<2x128xf32>
    %77 = math.tanh %76 : vector<2x128xf32>
    %78 = vector.broadcast %5 : vector<1x128xf32> to vector<2x128xf32>
    %79 = arith.mulf %77, %78 : vector<2x128xf32>
    %80 = vector.broadcast %6 : vector<1x128xf32> to vector<2x128xf32>
    %81 = arith.addf %79, %80 : vector<2x128xf32>
    %82 = vector.extract_strided_slice %81 {offsets = [0, 0], sizes = [2, 32], strides = [1, 1]} : vector<2x128xf32> to vector<2x32xf32>
    %83 = vector.extract_strided_slice %81 {offsets = [0, 32], sizes = [2, 32], strides = [1, 1]} : vector<2x128xf32> to vector<2x32xf32>
    %84 = vector.extract_strided_slice %81 {offsets = [0, 64], sizes = [2, 32], strides = [1, 1]} : vector<2x128xf32> to vector<2x32xf32>
    %85 = vector.extract_strided_slice %81 {offsets = [0, 96], sizes = [2, 32], strides = [1, 1]} : vector<2x128xf32> to vector<2x32xf32>
    %86 = arith.mulf %83, %69 : vector<2x32xf32>
    %87 = arith.mulf %82, %84 : vector<2x32xf32>
    %88 = arith.addf %86, %87 : vector<2x32xf32>
    %89 = math.tanh %88 : vector<2x32xf32>
    %90 = arith.mulf %85, %89 : vector<2x32xf32>
    %91 = vector.extract_strided_slice %12 {offsets = [8, 0], sizes = [2, 128], strides = [1, 1]} : vector<16x128xf32> to vector<2x128xf32>
    %cst_14 = arith.constant dense<0.000000e+00> : vector<2x128xf32>
    %92 = tpu.matmul %90, %0, %cst_14 {dimension_numbers = #tpu.dot_dimension_numbers<[1], [0], [0], [1], [0, 0, 1, 1], [], []>} : vector<2x32xf32>, vector<32x128xf32>, vector<2x128xf32> -> vector<2x128xf32>
    %93 = arith.addf %91, %92 : vector<2x128xf32>
    %94 = vector.broadcast %5 : vector<1x128xf32> to vector<2x128xf32>
    %95 = arith.mulf %93, %94 : vector<2x128xf32>
    %96 = math.tanh %95 : vector<2x128xf32>
    %97 = vector.broadcast %5 : vector<1x128xf32> to vector<2x128xf32>
    %98 = arith.mulf %96, %97 : vector<2x128xf32>
    %99 = vector.broadcast %6 : vector<1x128xf32> to vector<2x128xf32>
    %100 = arith.addf %98, %99 : vector<2x128xf32>
    %101 = vector.extract_strided_slice %100 {offsets = [0, 0], sizes = [2, 32], strides = [1, 1]} : vector<2x128xf32> to vector<2x32xf32>
    %102 = vector.extract_strided_slice %100 {offsets = [0, 32], sizes = [2, 32], strides = [1, 1]} : vector<2x128xf32> to vector<2x32xf32>
    %103 = vector.extract_strided_slice %100 {offsets = [0, 64], sizes = [2, 32], strides = [1, 1]} : vector<2x128xf32> to vector<2x32xf32>
    %104 = vector.extract_strided_slice %100 {offsets = [0, 96], sizes = [2, 32], strides = [1, 1]} : vector<2x128xf32> to vector<2x32xf32>
    %105 = arith.mulf %102, %88 : vector<2x32xf32>
    %106 = arith.mulf %101, %103 : vector<2x32xf32>
    %107 = arith.addf %105, %106 : vector<2x32xf32>
    %108 = math.tanh %107 : vector<2x32xf32>
    %109 = arith.mulf %104, %108 : vector<2x32xf32>
    %110 = vector.extract_strided_slice %12 {offsets = [10, 0], sizes = [2, 128], strides = [1, 1]} : vector<16x128xf32> to vector<2x128xf32>
    %cst_15 = arith.constant dense<0.000000e+00> : vector<2x128xf32>
    %111 = tpu.matmul %109, %0, %cst_15 {dimension_numbers = #tpu.dot_dimension_numbers<[1], [0], [0], [1], [0, 0, 1, 1], [], []>} : vector<2x32xf32>, vector<32x128xf32>, vector<2x128xf32> -> vector<2x128xf32>
    %112 = arith.addf %110, %111 : vector<2x128xf32>
    %113 = vector.broadcast %5 : vector<1x128xf32> to vector<2x128xf32>
    %114 = arith.mulf %112, %113 : vector<2x128xf32>
    %115 = math.tanh %114 : vector<2x128xf32>
    %116 = vector.broadcast %5 : vector<1x128xf32> to vector<2x128xf32>
    %117 = arith.mulf %115, %116 : vector<2x128xf32>
    %118 = vector.broadcast %6 : vector<1x128xf32> to vector<2x128xf32>
    %119 = arith.addf %117, %118 : vector<2x128xf32>
    %120 = vector.extract_strided_slice %119 {offsets = [0, 0], sizes = [2, 32], strides = [1, 1]} : vector<2x128xf32> to vector<2x32xf32>
    %121 = vector.extract_strided_slice %119 {offsets = [0, 32], sizes = [2, 32], strides = [1, 1]} : vector<2x128xf32> to vector<2x32xf32>
    %122 = vector.extract_strided_slice %119 {offsets = [0, 64], sizes = [2, 32], strides = [1, 1]} : vector<2x128xf32> to vector<2x32xf32>
    %123 = vector.extract_strided_slice %119 {offsets = [0, 96], sizes = [2, 32], strides = [1, 1]} : vector<2x128xf32> to vector<2x32xf32>
    %124 = arith.mulf %121, %107 : vector<2x32xf32>
    %125 = arith.mulf %120, %122 : vector<2x32xf32>
    %126 = arith.addf %124, %125 : vector<2x32xf32>
    %127 = math.tanh %126 : vector<2x32xf32>
    %128 = arith.mulf %123, %127 : vector<2x32xf32>
    %129 = vector.extract_strided_slice %12 {offsets = [12, 0], sizes = [2, 128], strides = [1, 1]} : vector<16x128xf32> to vector<2x128xf32>
    %cst_16 = arith.constant dense<0.000000e+00> : vector<2x128xf32>
    %130 = tpu.matmul %128, %0, %cst_16 {dimension_numbers = #tpu.dot_dimension_numbers<[1], [0], [0], [1], [0, 0, 1, 1], [], []>} : vector<2x32xf32>, vector<32x128xf32>, vector<2x128xf32> -> vector<2x128xf32>
    %131 = arith.addf %129, %130 : vector<2x128xf32>
    %132 = vector.broadcast %5 : vector<1x128xf32> to vector<2x128xf32>
    %133 = arith.mulf %131, %132 : vector<2x128xf32>
    %134 = math.tanh %133 : vector<2x128xf32>
    %135 = vector.broadcast %5 : vector<1x128xf32> to vector<2x128xf32>
    %136 = arith.mulf %134, %135 : vector<2x128xf32>
    %137 = vector.broadcast %6 : vector<1x128xf32> to vector<2x128xf32>
    %138 = arith.addf %136, %137 : vector<2x128xf32>
    %139 = vector.extract_strided_slice %138 {offsets = [0, 0], sizes = [2, 32], strides = [1, 1]} : vector<2x128xf32> to vector<2x32xf32>
    %140 = vector.extract_strided_slice %138 {offsets = [0, 32], sizes = [2, 32], strides = [1, 1]} : vector<2x128xf32> to vector<2x32xf32>
    %141 = vector.extract_strided_slice %138 {offsets = [0, 64], sizes = [2, 32], strides = [1, 1]} : vector<2x128xf32> to vector<2x32xf32>
    %142 = vector.extract_strided_slice %138 {offsets = [0, 96], sizes = [2, 32], strides = [1, 1]} : vector<2x128xf32> to vector<2x32xf32>
    %143 = arith.mulf %140, %126 : vector<2x32xf32>
    %144 = arith.mulf %139, %141 : vector<2x32xf32>
    %145 = arith.addf %143, %144 : vector<2x32xf32>
    %146 = math.tanh %145 : vector<2x32xf32>
    %147 = arith.mulf %142, %146 : vector<2x32xf32>
    %148 = vector.extract_strided_slice %12 {offsets = [14, 0], sizes = [2, 128], strides = [1, 1]} : vector<16x128xf32> to vector<2x128xf32>
    %cst_17 = arith.constant dense<0.000000e+00> : vector<2x128xf32>
    %149 = tpu.matmul %147, %0, %cst_17 {dimension_numbers = #tpu.dot_dimension_numbers<[1], [0], [0], [1], [0, 0, 1, 1], [], []>} : vector<2x32xf32>, vector<32x128xf32>, vector<2x128xf32> -> vector<2x128xf32>
    %150 = arith.addf %148, %149 : vector<2x128xf32>
    %151 = vector.broadcast %5 : vector<1x128xf32> to vector<2x128xf32>
    %152 = arith.mulf %150, %151 : vector<2x128xf32>
    %153 = math.tanh %152 : vector<2x128xf32>
    %154 = vector.broadcast %5 : vector<1x128xf32> to vector<2x128xf32>
    %155 = arith.mulf %153, %154 : vector<2x128xf32>
    %156 = vector.broadcast %6 : vector<1x128xf32> to vector<2x128xf32>
    %157 = arith.addf %155, %156 : vector<2x128xf32>
    %158 = vector.extract_strided_slice %157 {offsets = [0, 0], sizes = [2, 32], strides = [1, 1]} : vector<2x128xf32> to vector<2x32xf32>
    %159 = vector.extract_strided_slice %157 {offsets = [0, 32], sizes = [2, 32], strides = [1, 1]} : vector<2x128xf32> to vector<2x32xf32>
    %160 = vector.extract_strided_slice %157 {offsets = [0, 64], sizes = [2, 32], strides = [1, 1]} : vector<2x128xf32> to vector<2x32xf32>
    %161 = vector.extract_strided_slice %157 {offsets = [0, 96], sizes = [2, 32], strides = [1, 1]} : vector<2x128xf32> to vector<2x32xf32>
    %162 = arith.mulf %159, %145 : vector<2x32xf32>
    %163 = arith.mulf %158, %160 : vector<2x32xf32>
    %164 = arith.addf %162, %163 : vector<2x32xf32>
    %165 = math.tanh %164 : vector<2x32xf32>
    %166 = arith.mulf %161, %165 : vector<2x32xf32>
    %167 = vector.broadcast %3 : vector<1x32xf32> to vector<2x32xf32>
    %168 = arith.mulf %166, %167 : vector<2x32xf32>
    %cst_18 = arith.constant dense<0.000000e+00> : vector<2xf32>
    %169 = vector.multi_reduction <add>, %168, %cst_18 [1] : vector<2x32xf32> to vector<2xf32>
    %170 = vector.shape_cast %169 : vector<2xf32> to vector<2x1xf32>
    %171 = vector.broadcast %4 : vector<1x1xf32> to vector<2x1xf32>
    %172 = arith.addf %170, %171 : vector<2x1xf32>
    %c0_19 = arith.constant 0 : index
    %c0_20 = arith.constant 0 : index
    %173 = vector.load %arg2[%c0_19, %c0_20] : memref<2x1xf32, #tpu.memory_space<vmem>>, vector<2x1xf32>
    tpu.vector_store %arg2[%c0_19, %c0_20], %172 {strides = array<i32>} : memref<2x1xf32, #tpu.memory_space<vmem>>, vector<2x1xf32>,
    return
  }
}

</mosaic_0001>

<bundles_post_ra>
// kernel: tpu_custom_call.1
= control target key start
LH: loop header
LB: loop body
LE: loop exit
PB: predicated region body
PF: predicated region fallthrough
CT: control target
= control target key end

     0   :  { %7 = vsyncpa [#allocation3], 0  ;;  %s1172_s9 = smov [#allocation2]   ;;  %s1358_s0 = inlined_call_operand.vmem [shape: f32[16,1], index: 0, kind: input, shape index: {}]   ;;  %s1359_s1 = inlined_call_operand.hbm [shape: f32[38,128], index: 1, kind: input, shape index: {}]   ;;  %s1360_s2 = inlined_call_operand.vmem [shape: f32[2,1], index: 2, kind: output, shape index: {}]  }
   0x1   :  { %s15_s10 = sshll.u32 %s1172_s9, 4  ;;  %s1148_s13 = scalar_lea.hbm %s1359_s1, 640  ;;  %s16_s10 = int_to_ptr.vmem [resolvable:$true] %s15_s10 }
   0x2   :  { %p1149_p0 = scmp.ne.s32.totalorder %s1359_s1, %s1148_s13  ;;  %p1152_p1 = scmp.lt.u32.totalorder %s1148_s13, %s1359_s1 }
   0x4   :  { %p1154_p2 = pnand %p1152_p1, %p1149_p0 }
   0x6   :  { %1157 = shalt.err (!%p1154_p2)
}
   0x7   :  { %s1158_s18 = scalar_lea.vmem %s16_s10, 640  ;;  %p1163_p4 = scmp.lt.s32.totalorder %s16_s10, %s16_s10 }
   0x8   :  { %p1159_p3 = scmp.ne.s32.totalorder %s16_s10, %s1158_s18  ;;  %p1164_p5 = scmp.lt.s32.totalorder %s1158_s18, %s1158_s18 }
   0xa   :  { %p1165_p6 = por %p1164_p5, %p1163_p4 }
   0xc   :  { %p1166_p7 = pnand %p1165_p6, %p1159_p3 }
   0xe   :  { %1169 = shalt.err (!%p1166_p7)
}
   0xf   :  { %s1173_s19 = smov 128   ;;  %s1174_s20 = smov 8  }
  0x10   :  { %21 = dma.hbm_to_vmem [thread:$0]  %s1359_s1, 640, %s16_s10, [#allocation3], %s1173_s19, %s1173_s19, %s1174_s20  }
  0x11   :  { %1170 = dma.done.wait [#allocation3], 640  }
  0x12   :  { %1171 = vsyncadd [#allocation3], 4294966656  ;;  %v1175_v0 = vmov 0.0|0.0   ;;  %vm1176_vm0 = vmmov 0   ;;  %v1177_v1 = vmov 0.0   ;;  %v1178_v2 = vmov 0  }
  0x13   :  { %1056 = vmatprep.subr.bf16.mxu0 %v1175_v0  ;;  %976 = vmatprep.mubr.msk.f32.mxu0 %vm1176_vm0, %v1177_v1  ;;  %v25_v3 = vld [vmem:[#allocation2] sm:$0xff]  ;;  %v26_v4 = vld [vmem:[#allocation2 + $0x8] sm:$0xff]  ;;  %v27_v5 = vld [vmem:[#allocation2 + $0x10] sm:$0xff]  ;;  %s1179_s24 = smov 64   ;;  %s1180_s25 = smov 32   ;;  %vm59_vm1 = vcmask 261120  }
  0x14   :  { %1114 = vset.pattern.permute.xlu0 %v1178_v2  ;;  %1062 = vmatprep.subr.bf16.mxu1 %v1175_v0  ;;  %v1215_v6 = vpack.c.bf16 %v26_v4, %v25_v3  ;;  %v28_v7 = vld [vmem:[#allocation2 + $0x18] sm:$0xff]  ;;  %v35_v8 = vld [vmem:[%s1358_s0] sm:$0xff]  ;;  %vm899_vm2 = vcmask 261126   ;;  %vm908_vm3 = vcmask 7174  }
  0x15   :  { %987 = vmatprep.mubr.msk.f32.mxu1 %vm1176_vm0, %v1177_v1  ;;  %1115 = vset.pattern.permute.xlu1 %v1178_v2  ;;  %v1221_v9 = vpack.c.bf16 %v28_v7, %v27_v5  ;;  %v1237_v11 = vld [vmem:[#allocation2 + $0x20] ss:$0 sm:$0xff]  ;;  %v1240_v13 = vld [vmem:[#allocation2 + $0x21] ss:$0 sm:$0xff]  ;;  %v1245_v15 = vld [vmem:[#allocation2 + $0x24] ss:$0 sm:$0xff] }
  0x16   :  { %39 = vperm.xlu0 %1114, %v35_v8   ;;  %1058 = vmatpush3.bf16.msra.mxu0 %v1215_v6  ;;  %v1249_v21 = vld [vmem:[#allocation2 + $0x25] ss:$0 sm:$0xff] }
  0x17   :  { %1064 = vmatpush3.bf16.msra.mxu1 %v1215_v6  ;;  %1059 = vmatprep.subr.bf16.mxu0 %v1175_v0 }
  0x18   :  { %1065 = vmatprep.subr.bf16.mxu1 %v1175_v0 }
  0x1a   :  { %1061 = vmatpush3.bf16.msra.mxu0 %v1221_v9 }
  0x1b   :  { %1067 = vmatpush3.bf16.msra.mxu1 %v1221_v9  ;;  %1068 = vmatprep.subr.bf16.mxu0 %v1175_v0 }
  0x1c   :  { %1074 = vmatprep.subr.bf16.mxu1 %v1175_v0 }
  0x1d   :  { %977 = vmatmul.mubr.f32.vlgmr.msra.gmra.mrb[0].mxu0 %v1177_v1 }
  0x1e   :  { %1070 = vmatpush3.bf16.msra.mxu0 %v1215_v6  ;;  %998 = vmatprep.mubr.msk.f32.mxu0 %vm1176_vm0, %v1177_v1 }
  0x1f   :  { %1071 = vmatprep.subr.bf16.mxu0 %v1175_v0 }
  0x22   :  { %1073 = vmatpush3.bf16.msra.mxu0 %v1221_v9 }
  0x23   :  { %1080 = vmatprep.subr.bf16.mxu0 %v1175_v0 }
  0x95   :  { %v40_v10 = vpop.permute.xlu0 %39 }
  0x96   :  { %v51_v12 = vmul.f32 %v1237_v11, %v40_v10 }
  0x98   :  { %v1243_v14 = vadd.f32 %v1240_v13, %v51_v12 }
  0xf0   :  { %v129_v16 = vpop.f32.mrb[0].mxu0 }
  0xf1   :  { %v133_v17 = vadd.f32 %v129_v16, %v1243_v14  ;;  %v978_v18 = vpop.f32.mrb[1].mxu0 }
  0xf3   :  { %v138_v19 = vmul.f32 %v1245_v15, %v133_v17 }
  0xf5   :  { %1116 = vtanh.f32 %v138_v19 }
  0xff   :  { %v1117_v20 = vpop.eup %1116 }
 0x100   :  { %v140_v22 = vmul.f32 %v1117_v20, %v1245_v15 }
 0x102   :  { %v145_v23 = vadd.f32 %v1249_v21, %v140_v22 }
 0x104   :  { %148 = vrot.lane.b32.xlu0 %v145_v23, %s1179_s24  ;;  %v146_v26 = vmul.f32 0.0, %v145_v23 }
 0x176   :  { %v149_v24 = vpop.permute.xlu0 %148 }
 0x177   :  { %v151_v25 = vmul.f32 %v149_v24, %v145_v23 }
 0x179   :  { %153 = vrot.lane.b32.xlu1 %v151_v25, %s1180_s25 }
 0x1eb   :  { %v154_v27 = vpop.permute.xlu1 %153 }
 0x1ec   :  { %v156_v28 = vadd.f32 %v154_v27, %v146_v26 }
 0x1ee   :  { %1118 = vtanh.f32 %v156_v28  ;;  %v247_v43 = vrot.slane %v156_v28, 6 }
 0x1f8   :  { %v1119_v29 = vpop.eup %1118 }
 0x1f9   :  { %159 = vrot.lane.b32.xlu1 %v1119_v29, %s1179_s24 }
 0x26b   :  { %v160_v30 = vpop.permute.xlu1 %159 }
 0x26c   :  { %v162_v31 = vmul.f32 %v160_v30, %v145_v23  ;;  %v36_v30 = vld [vmem:[%s1358_s0 + $0x8] sm:$0xff]  ;;  %s1181_s0 = smov 96  }
 0x26e   :  { %164 = vrot.lane.b32.xlu0 %v162_v31, %s1180_s25 }
 0x2e0   :  { %v165_v32 = vpop.permute.xlu0 %164 }
 0x2e1   :  { %988 = vmatmul.mubr.msk.f32.vlgmr.msra.gmra.mrb[0].mxu1 %vm59_vm1, %v165_v32 }
 0x2e2   :  { %1076 = vmatpush3.bf16.msra.mxu1 %v1215_v6  ;;  %1009 = vmatprep.mubr.msk.f32.mxu1 %vm1176_vm0, %v1177_v1 }
 0x2e3   :  { %1077 = vmatprep.subr.bf16.mxu1 %v1175_v0 }
 0x2e6   :  { %1079 = vmatpush3.bf16.msra.mxu1 %v1221_v9 }
 0x2e7   :  { %1086 = vmatprep.subr.bf16.mxu1 %v1175_v0 }
 0x3b4   :  { %v234_v33 = vpop.f32.mrb[0].mxu1 }
 0x3b5   :  { %v239_v34 = vrot.slane %v234_v33, 6  ;;  %v989_v35 = vpop.f32.mrb[1].mxu1 }
 0x3b7   :  { %v241_v36 = vadd.f32 %v239_v34, %v1243_v14 }
 0x3b9   :  { %v242_v37 = vmul.f32 %v1245_v15, %v241_v36 }
 0x3bb   :  { %1120 = vtanh.f32 %v242_v37 }
 0x3c5   :  { %v1121_v38 = vpop.eup %1120 }
 0x3c6   :  { %v244_v39 = vmul.f32 %v1121_v38, %v1245_v15 }
 0x3c8   :  { %v245_v40 = vadd.f32 %v1249_v21, %v244_v39 }
 0x3ca   :  { %251 = vrot.lane.b32.xlu1 %v245_v40, %s1179_s24  ;;  %v249_v44 = vmul.f32 %v247_v43, %v245_v40 }
 0x43c   :  { %v252_v41 = vpop.permute.xlu1 %251 }
 0x43d   :  { %v254_v42 = vmul.f32 %v252_v41, %v245_v40 }
 0x43f   :  { %256 = vrot.lane.b32.xlu0 %v254_v42, %s1180_s25 }
 0x4b1   :  { %v257_v45 = vpop.permute.xlu0 %256 }
 0x4b2   :  { %v259_v46 = vadd.f32 %v257_v45, %v249_v44 }
 0x4b4   :  { %1122 = vtanh.f32 %v259_v46  ;;  %v351_v62 = vrot.slane %v259_v46, 6 }
 0x4be   :  { %v1123_v47 = vpop.eup %1122 }
 0x4bf   :  { %262 = vrot.lane.b32.xlu1 %v1123_v47, %s1179_s24 }
 0x531   :  { %v263_v48 = vpop.permute.xlu1 %262 }
 0x532   :  { %v265_v49 = vmul.f32 %v263_v48, %v245_v40 }
 0x534   :  { %v267_v50 = vrot.slane %v265_v49, 2 }
 0x536   :  { %268 = vrot.lane.b32.xlu0 %v267_v50, %s1180_s25 }
 0x5a8   :  { %v269_v51 = vpop.permute.xlu0 %268 }
 0x5a9   :  { %999 = vmatmul.mubr.msk.f32.vlgmr.msra.gmra.mrb[2].mxu0 %vm59_vm1, %v269_v51 }
 0x5aa   :  { %1082 = vmatpush3.bf16.msra.mxu0 %v1215_v6  ;;  %1020 = vmatprep.mubr.msk.f32.mxu0 %vm1176_vm0, %v1177_v1 }
 0x5ab   :  { %1083 = vmatprep.subr.bf16.mxu0 %v1175_v0 }
 0x5ae   :  { %1085 = vmatpush3.bf16.msra.mxu0 %v1221_v9 }
 0x5af   :  { %1092 = vmatprep.subr.bf16.mxu0 %v1175_v0 }
 0x67c   :  { %v338_v52 = vpop.f32.mrb[2].mxu0 }
 0x67d   :  { %v343_v53 = vrot.slane %v338_v52, 4  ;;  %v1000_v54 = vpop.f32.mrb[3].mxu0 }
 0x67f   :  { %v345_v55 = vadd.f32 %v343_v53, %v1243_v14 }
 0x681   :  { %v346_v56 = vmul.f32 %v1245_v15, %v345_v55 }
 0x683   :  { %1124 = vtanh.f32 %v346_v56 }
 0x68d   :  { %v1125_v57 = vpop.eup %1124 }
 0x68e   :  { %v348_v58 = vmul.f32 %v1125_v57, %v1245_v15 }
 0x690   :  { %v349_v59 = vadd.f32 %v1249_v21, %v348_v58 }
 0x692   :  { %355 = vrot.lane.b32.xlu1 %v349_v59, %s1179_s24  ;;  %v353_v63 = vmul.f32 %v351_v62, %v349_v59 }
 0x704   :  { %v356_v60 = vpop.permute.xlu1 %355 }
 0x705   :  { %v358_v61 = vmul.f32 %v356_v60, %v349_v59 }
 0x707   :  { %360 = vrot.lane.b32.xlu0 %v358_v61, %s1180_s25 }
 0x779   :  { %v361_v2 = vpop.permute.xlu0 %360 }
 0x77a   :  { %v363_v3 = vadd.f32 %v361_v2, %v353_v63 }
 0x77c   :  { %1126 = vtanh.f32 %v363_v3  ;;  %v455_v26 = vrot.slane %v363_v3, 6 }
 0x786   :  { %v1127_v4 = vpop.eup %1126 }
 0x787   :  { %366 = vrot.lane.b32.xlu1 %v1127_v4, %s1179_s24 }
 0x7f9   :  { %v367_v5 = vpop.permute.xlu1 %366 }
 0x7fa   :  { %v369_v7 = vmul.f32 %v367_v5, %v349_v59 }
 0x7fc   :  { %v371_v8 = vrot.slane %v369_v7, 4 }
 0x7fe   :  { %372 = vrot.lane.b32.xlu0 %v371_v8, %s1180_s25 }
 0x870   :  { %v373_v10 = vpop.permute.xlu0 %372 }
 0x871   :  { %1010 = vmatmul.mubr.msk.f32.vlgmr.msra.gmra.mrb[2].mxu1 %vm59_vm1, %v373_v10 }
 0x872   :  { %1088 = vmatpush3.bf16.msra.mxu1 %v1215_v6  ;;  %1031 = vmatprep.mubr.msk.f32.mxu1 %vm1176_vm0, %v1177_v1 }
 0x873   :  { %1089 = vmatprep.subr.bf16.mxu1 %v1175_v0 }
 0x876   :  { %1091 = vmatpush3.bf16.msra.mxu1 %v1221_v9 }
 0x877   :  { %1098 = vmatprep.subr.bf16.mxu1 %v1175_v0 }
 0x944   :  { %v442_v12 = vpop.f32.mrb[2].mxu1 }
 0x945   :  { %v447_v16 = vrot.slane %v442_v12, 2  ;;  %v1011_v17 = vpop.f32.mrb[3].mxu1 }
 0x947   :  { %v449_v18 = vadd.f32 %v447_v16, %v1243_v14 }
 0x949   :  { %v450_v19 = vmul.f32 %v1245_v15, %v449_v18 }
 0x94b   :  { %1128 = vtanh.f32 %v450_v19 }
 0x955   :  { %v1129_v20 = vpop.eup %1128 }
 0x956   :  { %v452_v22 = vmul.f32 %v1129_v20, %v1245_v15 }
 0x958   :  { %v453_v23 = vadd.f32 %v1249_v21, %v452_v22 }
 0x95a   :  { %459 = vrot.lane.b32.xlu1 %v453_v23, %s1179_s24  ;;  %v457_v27 = vmul.f32 %v455_v26, %v453_v23 }
 0x9cc   :  { %v460_v24 = vpop.permute.xlu1 %459 }
 0x9cd   :  { %v462_v25 = vmul.f32 %v460_v24, %v453_v23 }
 0x9cf   :  { %464 = vrot.lane.b32.xlu0 %v462_v25, %s1180_s25 }
 0xa41   :  { %v465_v28 = vpop.permute.xlu0 %464 }
 0xa42   :  { %v467_v29 = vadd.f32 %v465_v28, %v457_v27 }
 0xa44   :  { %1130 = vtanh.f32 %v467_v29 }
 0xa4e   :  { %v1131_v14 = vpop.eup %1130 }
 0xa4f   :  { %470 = vrot.lane.b32.xlu1 %v1131_v14, %s1179_s24 }
 0xa53   :  { %44 = vperm.xlu1 %1115, %v36_v30  }
 0xac1   :  { %v471_v31 = vpop.permute.xlu1 %470 }
 0xac2   :  { %v473_v32 = vmul.f32 %v471_v31, %v453_v23 }
 0xac4   :  { %v475_v33 = vrot.slane %v473_v32, 6 }
 0xac6   :  { %476 = vrot.lane.b32.xlu0 %v475_v33, %s1180_s25 }
 0xad2   :  { %v45_v35 = vpop.permute.xlu1 %44 }
 0xad3   :  { %v52_v36 = vmul.f32 %v1237_v11, %v45_v35  ;;  %v556_v11 = vrot.slane %v467_v29, 6 }
 0xad5   :  { %v1313_v37 = vadd.f32 %v1240_v13, %v52_v36 }
 0xb38   :  { %v477_v34 = vpop.permute.xlu0 %476 }
 0xb39   :  { %1021 = vmatmul.mubr.msk.f32.vlgmr.msra.gmra.mrb[4].mxu0 %vm59_vm1, %v477_v34 }
 0xb3a   :  { %1094 = vmatpush3.bf16.msra.mxu0 %v1215_v6  ;;  %1042 = vmatprep.mubr.msk.f32.mxu0 %vm1176_vm0, %v1177_v1 }
 0xb3b   :  { %1095 = vmatprep.subr.bf16.mxu0 %v1175_v0 }
 0xb3e   :  { %1097 = vmatpush3.bf16.msra.mxu0 %v1221_v9 }
 0xc0c   :  { %v546_v38 = vpop.f32.mrb[4].mxu0 }
 0xc0d   :  { %v550_v39 = vadd.f32 %v546_v38, %v1313_v37  ;;  %v1022_v40 = vpop.f32.mrb[5].mxu0 }
 0xc0f   :  { %v551_v41 = vmul.f32 %v1245_v15, %v550_v39 }
 0xc11   :  { %1132 = vtanh.f32 %v551_v41 }
 0xc1b   :  { %v1133_v42 = vpop.eup %1132 }
 0xc1c   :  { %v553_v43 = vmul.f32 %v1133_v42, %v1245_v15  ;;  %v926_v42 = vld [vmem:[#allocation2 + $0x22] ss:$0 sm:$0xff] }
 0xc1e   :  { %v554_v44 = vadd.f32 %v1249_v21, %v553_v43 }
 0xc20   :  { %560 = vrot.lane.b32.xlu0 %v554_v44, %s1179_s24  ;;  %v558_v13 = vmul.f32 %v556_v11, %v554_v44 }
 0xc92   :  { %v561_v45 = vpop.permute.xlu0 %560 }
 0xc93   :  { %v563_v46 = vmul.f32 %v561_v45, %v554_v44 }
 0xc95   :  { %565 = vrot.lane.b32.xlu1 %v563_v46, %s1180_s25 }
 0xd07   :  { %v566_v47 = vpop.permute.xlu1 %565 }
 0xd08   :  { %v568_v48 = vadd.f32 %v566_v47, %v558_v13 }
 0xd0a   :  { %1134 = vtanh.f32 %v568_v48 }
 0xd14   :  { %v1135_v49 = vpop.eup %1134 }
 0xd15   :  { %571 = vrot.lane.b32.xlu0 %v1135_v49, %s1179_s24  ;;  %v927_v49 = vld [vmem:[#allocation2 + $0x23] ss:$0 sm:$0xff] }
 0xd87   :  { %v572_v50 = vpop.permute.xlu0 %571 }
 0xd88   :  { %v574_v51 = vmul.f32 %v572_v50, %v554_v44 }
 0xd8a   :  { %576 = vrot.lane.b32.xlu1 %v574_v51, %s1180_s25 }
 0xdfc   :  { %v577_v52 = vpop.permute.xlu1 %576 }
 0xdfd   :  { %1032 = vmatmul.mubr.msk.f32.vlgmr.msra.gmra.mrb[4].mxu1 %vm59_vm1, %v577_v52 }
 0xdfe   :  { %1100 = vmatpush3.bf16.msra.mxu1 %v1215_v6  ;;  %1053 = vmatprep.mubr.msk.f32.mxu1 %vm1176_vm0, %v1177_v1 }
 0xdff   :  { %1101 = vmatprep.subr.bf16.mxu1 %v1175_v0  ;;  %v659_v0 = vrot.slane %v568_v48, 6 }
 0xe02   :  { %1103 = vmatpush3.bf16.msra.mxu1 %v1221_v9 }
 0xed0   :  { %v646_v53 = vpop.f32.mrb[4].mxu1 }
 0xed1   :  { %v651_v54 = vrot.slane %v646_v53, 6  ;;  %v1033_v55 = vpop.f32.mrb[5].mxu1 }
 0xed3   :  { %v653_v56 = vadd.f32 %v651_v54, %v1313_v37 }
 0xed5   :  { %v654_v57 = vmul.f32 %v1245_v15, %v653_v56 }
 0xed7   :  { %1136 = vtanh.f32 %v654_v57 }
 0xee1   :  { %v1137_v58 = vpop.eup %1136 }
 0xee2   :  { %v656_v59 = vmul.f32 %v1137_v58, %v1245_v15 }
 0xee4   :  { %v657_v6 = vadd.f32 %v1249_v21, %v656_v59 }
 0xee6   :  { %663 = vrot.lane.b32.xlu0 %v657_v6, %s1179_s24  ;;  %v661_v9 = vmul.f32 %v659_v0, %v657_v6 }
 0xf58   :  { %v664_v1 = vpop.permute.xlu0 %663 }
 0xf59   :  { %v666_v60 = vmul.f32 %v664_v1, %v657_v6 }
 0xf5b   :  { %668 = vrot.lane.b32.xlu1 %v666_v60, %s1180_s25 }
 0xfcd   :  { %v669_v61 = vpop.permute.xlu1 %668 }
 0xfce   :  { %v671_v62 = vadd.f32 %v669_v61, %v661_v9 }
 0xfd0   :  { %1138 = vtanh.f32 %v671_v62  ;;  %v763_v23 = vrot.slane %v671_v62, 6 }
 0xfda   :  { %v1139_v63 = vpop.eup %1138 }
 0xfdb   :  { %674 = vrot.lane.b32.xlu0 %v1139_v63, %s1179_s24 }
0x104d   :  { %v675_v2 = vpop.permute.xlu0 %674 }
0x104e   :  { %v677_v3 = vmul.f32 %v675_v2, %v657_v6 }
0x1050   :  { %v679_v4 = vrot.slane %v677_v3, 2 }
0x1052   :  { %680 = vrot.lane.b32.xlu1 %v679_v4, %s1180_s25 }
0x10c4   :  { %v681_v5 = vpop.permute.xlu1 %680 }
0x10c5   :  { %1043 = vmatmul.mubr.msk.f32.vlgmr.msra.gmra.mrb[6].mxu0 %vm59_vm1, %v681_v5 }
0x1198   :  { %v750_v7 = vpop.f32.mrb[6].mxu0 }
0x1199   :  { %v755_v8 = vrot.slane %v750_v7, 4  ;;  %v1044_v10 = vpop.f32.mrb[7].mxu0 }
0x119b   :  { %v757_v12 = vadd.f32 %v755_v8, %v1313_v37 }
0x119d   :  { %v758_v16 = vmul.f32 %v1245_v15, %v757_v12 }
0x119f   :  { %1140 = vtanh.f32 %v758_v16 }
0x11a9   :  { %v1141_v17 = vpop.eup %1140 }
0x11aa   :  { %v760_v18 = vmul.f32 %v1141_v17, %v1245_v15 }
0x11ac   :  { %v761_v19 = vadd.f32 %v1249_v21, %v760_v18 }
0x11ae   :  { %767 = vrot.lane.b32.xlu0 %v761_v19, %s1179_s24  ;;  %v765_v24 = vmul.f32 %v763_v23, %v761_v19 }
0x1220   :  { %v768_v20 = vpop.permute.xlu0 %767 }
0x1221   :  { %v770_v22 = vmul.f32 %v768_v20, %v761_v19 }
0x1223   :  { %772 = vrot.lane.b32.xlu1 %v770_v22, %s1180_s25 }
0x1295   :  { %v773_v25 = vpop.permute.xlu1 %772 }
0x1296   :  { %v775_v26 = vadd.f32 %v773_v25, %v765_v24 }
0x1298   :  { %1142 = vtanh.f32 %v775_v26  ;;  %v867_v43 = vrot.slane %v775_v26, 6 }
0x12a2   :  { %v1143_v27 = vpop.eup %1142 }
0x12a3   :  { %778 = vrot.lane.b32.xlu0 %v1143_v27, %s1179_s24 }
0x1315   :  { %v779_v28 = vpop.permute.xlu0 %778 }
0x1316   :  { %v781_v29 = vmul.f32 %v779_v28, %v761_v19 }
0x1318   :  { %v783_v14 = vrot.slane %v781_v29, 4 }
0x131a   :  { %784 = vrot.lane.b32.xlu1 %v783_v14, %s1180_s25 }
0x138c   :  { %v785_v30 = vpop.permute.xlu1 %784 }
0x138d   :  { %1054 = vmatmul.mubr.msk.f32.vlgmr.msra.gmra.mrb[6].mxu1 %vm59_vm1, %v785_v30 }
0x1460   :  { %v854_v31 = vpop.f32.mrb[6].mxu1 }
0x1461   :  { %v859_v32 = vrot.slane %v854_v31, 2  ;;  %v1055_v33 = vpop.f32.mrb[7].mxu1 }
0x1463   :  { %v861_v34 = vadd.f32 %v859_v32, %v1313_v37 }
0x1465   :  { %v862_v35 = vmul.f32 %v1245_v15, %v861_v34 }
0x1467   :  { %1144 = vtanh.f32 %v862_v35 }
0x1471   :  { %v1145_v36 = vpop.eup %1144 }
0x1472   :  { %v864_v38 = vmul.f32 %v1145_v36, %v1245_v15 }
0x1474   :  { %v865_v39 = vadd.f32 %v1249_v21, %v864_v38 }
0x1476   :  { %871 = vrot.lane.b32.xlu0 %v865_v39, %s1179_s24  ;;  %v869_v44 = vmul.f32 %v867_v43, %v865_v39 }
0x14e8   :  { %v872_v40 = vpop.permute.xlu0 %871 }
0x14e9   :  { %v874_v41 = vmul.f32 %v872_v40, %v865_v39 }
0x14eb   :  { %876 = vrot.lane.b32.xlu1 %v874_v41, %s1180_s25 }
0x14ef   :  { %891 = vrot.lane.b32.xlu1 %v926_v42, %s1181_s0 }
0x155d   :  { %v877_v37 = vpop.permute.xlu1 %876 }
0x155e   :  { %v879_v45 = vadd.f32 %v877_v37, %v869_v44 }
0x1560   :  { %1146 = vtanh.f32 %v879_v45 }
0x1561   :  { %v892_v11 = vpop.permute.xlu1 %891 }
0x156a   :  { %v1147_v46 = vpop.eup %1146 }
0x156b   :  { %882 = vrot.lane.b32.xlu0 %v1147_v46, %s1179_s24 }
0x15dd   :  { %v883_v15 = vpop.permute.xlu0 %882 }
0x15de   :  { %v885_v21 = vmul.f32 %v883_v15, %v865_v39 }
0x15e0   :  { %v894_v13 = vmul.f32 %v892_v11, %v885_v21 }
0x15e2   :  { %896 = vrot.lane.b32.xlu0 %v894_v13, %s1180_s25 }
0x1654   :  { %v897_v47 = vpop.permute.xlu0 %896 }
0x1655   :  { %v900_v48 = vsel %vm899_vm2, %v897_v47, 0.0 }
0x1656   :  { %901 = vadd.xlane.f32.xlu1 %v900_v48 }
0x16e3   :  { %v902_v50 = vpop.xlane.xlu1 %901 }
0x16e4   :  { %v907_v51 = vadd.f32 %v927_v49, %v902_v50 }
0x16e6   :  { %909 = vst.msk [vmem:[%s1360_s2 - $0x6] sm:$0xc0] %vm908_vm3, %v907_v51 }
0x16e7   :  { %914 = vsyncpa [#allocation3], 1 }

</bundles_post_ra>
